<compile_context>
chip_gen: v7x
topology: tpu7x:2x2x1
jax: 0.10.0
libtpu: 0.0.40
codegen_flags: <defaults>
</compile_context>

<pallas_src>
import functools

import jax
import jax.numpy as jnp
from jax.experimental import pallas as pl
from jax.experimental.pallas import tpu as pltpu


# ----------------------------------------------------------------------------
# Kernel 1: LSTM recurrence.  One grid step = `steps` time steps.
# ----------------------------------------------------------------------------
def _lstm_chunk_kernel(gx_ref, whh_ref, h_out_ref, h_ref, c_ref, *,
                       hidden_size, steps):
    # zero-initialize the recurrent state on the very first chunk
    @pl.when(pl.program_id(0) == 0)
    def _init():
        h_ref[...] = jnp.zeros_like(h_ref)
        c_ref[...] = jnp.zeros_like(c_ref)

    H = hidden_size

    def step(t, carry):
        h_prev = h_ref[...]                         # (B, H)  bf16 (MXU operand)
        c_prev = c_ref[...]                         # (B, H)  f32
        # gates_t = (x_t @ W_ih^T + b)  [precomputed]  +  h_prev @ W_hh^T
        gates = gx_ref[t] + jnp.dot(
            h_prev, whh_ref[...], preferred_element_type=jnp.float32)  # (B, 4H)

        i_g = jax.nn.sigmoid(gates[:, 0 * H:1 * H])
        f_g = jax.nn.sigmoid(gates[:, 1 * H:2 * H])
        g_g = jnp.tanh(gates[:, 2 * H:3 * H])
        o_g = jax.nn.sigmoid(gates[:, 3 * H:4 * H])

        c_new = f_g * c_prev + i_g * g_g
        h_new = (o_g * jnp.tanh(c_new)).astype(jnp.bfloat16)

        c_ref[...] = c_new
        h_ref[...] = h_new
        h_out_ref[t] = h_new                        # (B, H) bf16 per step
        return carry

    jax.lax.fori_loop(0, steps, step, None, unroll=True)


# ----------------------------------------------------------------------------
# Kernel 2: fc projection, tiled over the vocab axis ("parallel" grid).
# logits[:, j*tv:(j+1)*tv] = h_all @ W_fc^T[:, tile] + b_fc[tile]
# ----------------------------------------------------------------------------
def _fc_kernel(h_ref, wfc_ref, bfc_ref, out_ref):
    out_ref[...] = (
        jnp.dot(h_ref[...], wfc_ref[...], preferred_element_type=jnp.float32)
        + bfc_ref[...]
    ).astype(out_ref.dtype)


# ----------------------------------------------------------------------------
# Forward pass
# ----------------------------------------------------------------------------
def decoder_rnn_forward(params, features, captions, *, time_block=4,
                        v_block=128, logits_dtype=jnp.float32):
    """features: (B, E) float; captions: (B, T) int32 -> (B, T+1, V)."""
    wih_t = params["wih_t"]            # (E, 4H)  bf16
    whh_t = params["whh_t"]            # (H, 4H)  bf16
    b = params["b"]                    # (1, 4H)  f32
    wfc_t = params["wfc_t"]            # (H, V)   bf16
    bfc = params["bfc"]                # (1, V)   f32

    B, T = captions.shape
    H = whh_t.shape[0]
    V = wfc_t.shape[1]
    S = T + 1

    # ---- glue: embedding gather + prepend image features -------------------
    emb = jnp.take(params["embed_w"], captions, axis=0)          # (B, T, E)
    x = jnp.concatenate([features[:, None, :], emb], axis=1)     # (B, S, E)

    # ---- hoisted, batched input projection (XLA matmul), time-major --------
    gates_x = jnp.einsum(
        "bse,eg->sbg", x.astype(jnp.bfloat16), wih_t,
        preferred_element_type=jnp.float32) + b                  # (S, B, 4H) f32

    # pad the time axis to a multiple of the per-grid-step chunk
    Tb = min(time_block, S) if S > 0 else 1
    S_pad = -(-S // Tb) * Tb
    if S_pad != S:
        gates_x = jnp.pad(gates_x, ((0, S_pad - S), (0, 0), (0, 0)))

    # ---- recurrent kernel: emits h_t only (no V-wide store in the loop) ----
    lstm_kernel = functools.partial(_lstm_chunk_kernel, hidden_size=H, steps=Tb)
    h_tm = pl.pallas_call(
        lstm_kernel,
        out_shape=jax.ShapeDtypeStruct((S_pad, B, H), jnp.bfloat16),
        grid=(S_pad // Tb,),
        in_specs=[
            pl.BlockSpec((Tb, B, 4 * H), lambda s: (s, 0, 0)),   # gates_x chunk
            pl.BlockSpec((H, 4 * H), lambda s: (0, 0)),          # W_hh^T resident
        ],
        out_specs=pl.BlockSpec((Tb, B, H), lambda s: (s, 0, 0)),  # h chunk
        scratch_shapes=[
            pltpu.VMEM((B, H), jnp.bfloat16),                    # h state (bf16)
            pltpu.VMEM((B, H), jnp.float32),                     # c state (f32)
        ],
        compiler_params=pltpu.CompilerParams(
            dimension_semantics=("arbitrary",)),                 # true recurrence
    )(gates_x, whh_t)

    # ---- tiny transpose of h (never the logits), then V-tiled fc matmul ----
    h_bs = jnp.transpose(h_tm[:S], (1, 0, 2)).reshape(B * S, H)  # (B*S, H) bf16

    tv = v_block if (V % v_block == 0) else V
    # TODO(synk): for very large B*S also tile the M axis; demo M=B*S is tiny.
    logits = pl.pallas_call(
        _fc_kernel,
        out_shape=jax.ShapeDtypeStruct((B * S, V), logits_dtype),
        grid=(V // tv,),
        in_specs=[
            pl.BlockSpec((B * S, H), lambda j: (0, 0)),          # h (resident)
            pl.BlockSpec((H, tv), lambda j: (0, j)),             # W_fc^T tile
            pl.BlockSpec((1, tv), lambda j: (0, j)),             # b_fc tile
        ],
        out_specs=pl.BlockSpec((B * S, tv), lambda j: (0, j)),   # lane-dense tile
        compiler_params=pltpu.CompilerParams(
            dimension_semantics=("parallel",)),                  # shardable axis
    )(h_bs, wfc_t, bfc)

    return logits.reshape(B, S, V)                               # no big transpose


# ----------------------------------------------------------------------------
# Pure-JAX reference mimicking the kernel's quantization (bf16 x/W/h, f32 acc)
# ----------------------------------------------------------------------------
def decoder_rnn_reference(params, features, captions):
    emb = jnp.take(params["embed_w"], captions, axis=0)
    x = jnp.concatenate([features[:, None, :], emb], axis=1)
    x = x.astype(jnp.bfloat16).astype(jnp.float32)
    wih = params["wih_t"].astype(jnp.float32)
    whh = params["whh_t"].astype(jnp.float32)
    wfc = params["wfc_t"].astype(jnp.float32)
    b, bfc = params["b"], params["bfc"]
    B = x.shape[0]
    H = whh.shape[0]

    def step(carry, x_t):
        h, c = carry
        gates = x_t @ wih + h @ whh + b
        i = jax.nn.sigmoid(gates[:, :H])
        f = jax.nn.sigmoid(gates[:, H:2 * H])
        g = jnp.tanh(gates[:, 2 * H:3 * H])
        o = jax.nn.sigmoid(gates[:, 3 * H:])
        c = f * c + i * g
        h = (o * jnp.tanh(c)).astype(jnp.bfloat16).astype(jnp.float32)
        return (h, c), h @ wfc + bfc

    init = (jnp.zeros((B, H), jnp.float32), jnp.zeros((B, H), jnp.float32))
    _, outs = jax.lax.scan(step, init, jnp.transpose(x, (1, 0, 2)))
    return jnp.transpose(outs, (1, 0, 2))


# ----------------------------------------------------------------------------
# Deterministic parameter construction (PyTorch-style initializers)
# ----------------------------------------------------------------------------
def make_params(key, embed_size, hidden_size, vocab_size):
    keys = jax.random.split(key, 7)
    bound = 1.0 / hidden_size ** 0.5

    embed_w = jax.random.normal(keys[0], (vocab_size, embed_size), jnp.float32)
    wih = jax.random.uniform(keys[1], (4 * hidden_size, embed_size),
                             jnp.float32, -bound, bound)
    whh = jax.random.uniform(keys[2], (4 * hidden_size, hidden_size),
                             jnp.float32, -bound, bound)
    bih = jax.random.uniform(keys[3], (4 * hidden_size,), jnp.float32, -bound, bound)
    bhh = jax.random.uniform(keys[4], (4 * hidden_size,), jnp.float32, -bound, bound)
    wfc = jax.random.uniform(keys[5], (vocab_size, hidden_size),
                             jnp.float32, -bound, bound)
    bfc = jax.random.uniform(keys[6], (vocab_size,), jnp.float32, -bound, bound)

    return {
        "embed_w": embed_w,                                        # (V, E) f32
        "wih_t": jnp.transpose(wih).astype(jnp.bfloat16),          # (E, 4H) bf16
        "whh_t": jnp.transpose(whh).astype(jnp.bfloat16),          # (H, 4H) bf16
        "b": (bih + bhh).reshape(1, 4 * hidden_size).astype(jnp.float32),
        "wfc_t": jnp.transpose(wfc).astype(jnp.bfloat16),          # (H, V) bf16
        "bfc": bfc.reshape(1, vocab_size).astype(jnp.float32),
    }


# ----------------------------------------------------------------------------
if __name__ == "__main__":
    key = jax.random.PRNGKey(0)
    pkey, fkey, ckey = jax.random.split(key, 3)

    batch, seq_len = 2, 8
    embed_size = 32
    hidden_size = 128     # multiple of 128 -> lane-aligned gate slices
    vocab_size = 256      # multiple of 128 -> lane-dense logits tiles

    params = make_params(pkey, embed_size, hidden_size, vocab_size)
    features = jax.random.normal(fkey, (batch, embed_size), jnp.float32)
    captions = jax.random.randint(ckey, (batch, seq_len), 0, vocab_size, jnp.int32)

    fwd = jax.jit(lambda f, c: decoder_rnn_forward(params, f, c))
    out = jax.block_until_ready(fwd(features, captions))

    assert out.shape == (batch, seq_len + 1, vocab_size), out.shape
    assert bool(jnp.all(jnp.isfinite(out)))

    ref = decoder_rnn_reference(params, features, captions)
    max_err = float(jnp.max(jnp.abs(out.astype(jnp.float32) - ref)))
    assert max_err < 2e-2, f"max abs error vs reference: {max_err}"

    print("KERNEL_OK")
</pallas_src>

<mosaic_0001>
module attributes {stable_mosaic.version = 11 : i64} {
  func.func @_fc_kernel(%arg0: i32, %arg1: memref<18x128xbf16, #tpu.memory_space<vmem>>, %arg2: memref<128x128xbf16, #tpu.memory_space<vmem>>, %arg3: memref<1x128xf32, #tpu.memory_space<vmem>>, %arg4: memref<18x128xf32, #tpu.memory_space<vmem>>) attributes {dimension_semantics = [#tpu.dimension_semantics<parallel>], iteration_bounds = array<i64: 2>, scalar_prefetch = 0 : i64, scratch_operands = 0 : i64, tpu.core_type = #tpu.core_type<tc>, window_params = [{pipeline_mode = #tpu.pipeline_mode<synchronous>, transform_indices = @transform_0, window_bounds = array<i64: 18, 128>}, {transform_indices = @transform_1, window_bounds = array<i64: 128, 128>}, {transform_indices = @transform_2, window_bounds = array<i64: 1, 128>}, {transform_indices = @transform_3, window_bounds = array<i64: 18, 128>}]} {
    %c0 = arith.constant 0 : index
    %c0_0 = arith.constant 0 : index
    %0 = vector.load %arg1[%c0, %c0_0] : memref<18x128xbf16, #tpu.memory_space<vmem>>, vector<18x128xbf16>
    %c0_1 = arith.constant 0 : index
    %c0_2 = arith.constant 0 : index
    %1 = vector.load %arg2[%c0_1, %c0_2] : memref<128x128xbf16, #tpu.memory_space<vmem>>, vector<128x128xbf16>
    %cst = arith.constant dense<0.000000e+00> : vector<18x128xf32>
    %2 = tpu.matmul %0, %1, %cst {dimension_numbers = #tpu.dot_dimension_numbers<[1], [0], [0], [1], [0, 0, 1, 1], [], []>} : vector<18x128xbf16>, vector<128x128xbf16>, vector<18x128xf32> -> vector<18x128xf32>
    %c0_3 = arith.constant 0 : index
    %c0_4 = arith.constant 0 : index
    %3 = vector.load %arg3[%c0_3, %c0_4] : memref<1x128xf32, #tpu.memory_space<vmem>>, vector<1x128xf32>
    %4 = vector.broadcast %3 : vector<1x128xf32> to vector<18x128xf32>
    %5 = arith.addf %2, %4 : vector<18x128xf32>
    %c0_5 = arith.constant 0 : index
    %c0_6 = arith.constant 0 : index
    %6 = vector.load %arg4[%c0_5, %c0_6] : memref<18x128xf32, #tpu.memory_space<vmem>>, vector<18x128xf32>
    tpu.vector_store %arg4[%c0_5, %c0_6], %5 {strides = array<i32>} : memref<18x128xf32, #tpu.memory_space<vmem>>, vector<18x128xf32>,
    return
  }
  func.func @transform_0(%arg0: i32) -> (i32, i32) {
    %c0_i32 = arith.constant 0 : i32
    %c0_i32_0 = arith.constant 0 : i32
    %c0_i32_1 = arith.constant 0 : i32
    return %c0_i32, %c0_i32_0 : i32, i32
  }
  func.func @transform_1(%arg0: i32) -> (i32, i32) {
    %c0_i32 = arith.constant 0 : i32
    %c0_i32_0 = arith.constant 0 : i32
    return %c0_i32, %arg0 : i32, i32
  }
  func.func @transform_2(%arg0: i32) -> (i32, i32) {
    %c0_i32 = arith.constant 0 : i32
    %c0_i32_0 = arith.constant 0 : i32
    return %c0_i32, %arg0 : i32, i32
  }
  func.func @transform_3(%arg0: i32) -> (i32, i32) {
    %c0_i32 = arith.constant 0 : i32
    %c0_i32_0 = arith.constant 0 : i32
    return %c0_i32, %arg0 : i32, i32
  }
}

module attributes {stable_mosaic.version = 11 : i64} {
  func.func @_lstm_chunk_kernel(%arg0: i32, %arg1: memref<4x2x512xf32, #tpu.memory_space<vmem>>, %arg2: memref<128x512xbf16, #tpu.memory_space<vmem>>, %arg3: memref<4x2x128xbf16, #tpu.memory_space<vmem>>, %arg4: memref<2x128xbf16, #tpu.memory_space<vmem>>, %arg5: memref<2x128xf32, #tpu.memory_space<vmem>>) attributes {dimension_semantics = [#tpu.dimension_semantics<arbitrary>], iteration_bounds = array<i64: 3>, scalar_prefetch = 0 : i64, scratch_operands = 2 : i64, tpu.core_type = #tpu.core_type<tc>, window_params = [{transform_indices = @transform_0, window_bounds = array<i64: 4, 2, 512>}, {pipeline_mode = #tpu.pipeline_mode<synchronous>, transform_indices = @transform_1, window_bounds = array<i64: 128, 512>}, {transform_indices = @transform_2, window_bounds = array<i64: 4, 2, 128>}]} {
    %c0_i32 = arith.constant 0 : i32
    %0 = arith.cmpi eq, %arg0, %c0_i32 : i32
    %1 = arith.extui %0 : i1 to i32
    %c0_i32_0 = arith.constant 0 : i32
    %2 = arith.cmpi ne, %1, %c0_i32_0 : i32
    scf.if %2 {
      %cst_72 = arith.constant 0.000000e+00 : bf16
      %163 = vector.broadcast %cst_72 : bf16 to vector<2x128xbf16>
      %c0_73 = arith.constant 0 : index
      %c0_74 = arith.constant 0 : index
      %164 = vector.load %arg4[%c0_73, %c0_74] : memref<2x128xbf16, #tpu.memory_space<vmem>>, vector<2x128xbf16>
      tpu.vector_store %arg4[%c0_73, %c0_74], %163 {strides = array<i32>} : memref<2x128xbf16, #tpu.memory_space<vmem>>, vector<2x128xbf16>,
      %cst_75 = arith.constant 0.000000e+00 : f32
      %165 = vector.broadcast %cst_75 : f32 to vector<2x128xf32>
      %c0_76 = arith.constant 0 : index
      %c0_77 = arith.constant 0 : index
      %166 = vector.load %arg5[%c0_76, %c0_77] : memref<2x128xf32, #tpu.memory_space<vmem>>, vector<2x128xf32>
      tpu.vector_store %arg5[%c0_76, %c0_77], %165 {strides = array<i32>} : memref<2x128xf32, #tpu.memory_space<vmem>>, vector<2x128xf32>,
    } else {
    }
    %c0_i32_1 = arith.constant 0 : i32
    %c0 = arith.constant 0 : index
    %c0_2 = arith.constant 0 : index
    %3 = vector.load %arg4[%c0, %c0_2] : memref<2x128xbf16, #tpu.memory_space<vmem>>, vector<2x128xbf16>
    %c0_3 = arith.constant 0 : index
    %c0_4 = arith.constant 0 : index
    %4 = vector.load %arg5[%c0_3, %c0_4] : memref<2x128xf32, #tpu.memory_space<vmem>>, vector<2x128xf32>
    %5 = arith.index_cast %c0_i32_1 : i32 to index
    %c0_5 = arith.constant 0 : index
    %c0_6 = arith.constant 0 : index
    %6 = vector.load %arg1[%5, %c0_5, %c0_6] : memref<4x2x512xf32, #tpu.memory_space<vmem>>, vector<1x2x512xf32>
    %7 = vector.shape_cast %6 : vector<1x2x512xf32> to vector<2x512xf32>
    %c0_7 = arith.constant 0 : index
    %c0_8 = arith.constant 0 : index
    %8 = vector.load %arg2[%c0_7, %c0_8] : memref<128x512xbf16, #tpu.memory_space<vmem>>, vector<128x512xbf16>
    %cst = arith.constant dense<0.000000e+00> : vector<2x512xf32>
    %9 = tpu.matmul %3, %8, %cst {dimension_numbers = #tpu.dot_dimension_numbers<[1], [0], [0], [1], [0, 0, 1, 1], [], []>} : vector<2x128xbf16>, vector<128x512xbf16>, vector<2x512xf32> -> vector<2x512xf32>
    %10 = arith.addf %7, %9 : vector<2x512xf32>
    %11 = vector.extract_strided_slice %10 {offsets = [0, 0], sizes = [2, 128], strides = [1, 1]} : vector<2x512xf32> to vector<2x128xf32>
    %12 = arith.negf %11 : vector<2x128xf32>
    %13 = math.exp %12 : vector<2x128xf32>
    %cst_9 = arith.constant 1.000000e+00 : f32
    %14 = vector.broadcast %cst_9 : f32 to vector<2x128xf32>
    %15 = arith.addf %14, %13 : vector<2x128xf32>
    %16 = arith.divf %14, %15 : vector<2x128xf32>
    %17 = vector.extract_strided_slice %10 {offsets = [0, 128], sizes = [2, 128], strides = [1, 1]} : vector<2x512xf32> to vector<2x128xf32>
    %18 = arith.negf %17 : vector<2x128xf32>
    %19 = math.exp %18 : vector<2x128xf32>
    %cst_10 = arith.constant 1.000000e+00 : f32
    %20 = vector.broadcast %cst_10 : f32 to vector<2x128xf32>
    %21 = arith.addf %20, %19 : vector<2x128xf32>
    %22 = arith.divf %20, %21 : vector<2x128xf32>
    %23 = vector.extract_strided_slice %10 {offsets = [0, 256], sizes = [2, 128], strides = [1, 1]} : vector<2x512xf32> to vector<2x128xf32>
    %24 = math.tanh %23 : vector<2x128xf32>
    %25 = vector.extract_strided_slice %10 {offsets = [0, 384], sizes = [2, 128], strides = [1, 1]} : vector<2x512xf32> to vector<2x128xf32>
    %26 = arith.negf %25 : vector<2x128xf32>
    %27 = math.exp %26 : vector<2x128xf32>
    %cst_11 = arith.constant 1.000000e+00 : f32
    %28 = vector.broadcast %cst_11 : f32 to vector<2x128xf32>
    %29 = arith.addf %28, %27 : vector<2x128xf32>
    %30 = arith.divf %28, %29 : vector<2x128xf32>
    %31 = arith.mulf %22, %4 : vector<2x128xf32>
    %32 = arith.mulf %16, %24 : vector<2x128xf32>
    %33 = arith.addf %31, %32 : vector<2x128xf32>
    %34 = math.tanh %33 : vector<2x128xf32>
    %35 = arith.mulf %30, %34 : vector<2x128xf32>
    %36 = arith.truncf %35 : vector<2x128xf32> to vector<2x128xbf16>
    %c0_12 = arith.constant 0 : index
    %c0_13 = arith.constant 0 : index
    %37 = vector.load %arg5[%c0_12, %c0_13] : memref<2x128xf32, #tpu.memory_space<vmem>>, vector<2x128xf32>
    tpu.vector_store %arg5[%c0_12, %c0_13], %33 {strides = array<i32>} : memref<2x128xf32, #tpu.memory_space<vmem>>, vector<2x128xf32>,
    %c0_14 = arith.constant 0 : index
    %c0_15 = arith.constant 0 : index
    %38 = vector.load %arg4[%c0_14, %c0_15] : memref<2x128xbf16, #tpu.memory_space<vmem>>, vector<2x128xbf16>
    tpu.vector_store %arg4[%c0_14, %c0_15], %36 {strides = array<i32>} : memref<2x128xbf16, #tpu.memory_space<vmem>>, vector<2x128xbf16>,
    %39 = arith.index_cast %c0_i32_1 : i32 to index
    %c0_16 = arith.constant 0 : index
    %c0_17 = arith.constant 0 : index
    %40 = vector.load %arg3[%39, %c0_16, %c0_17] : memref<4x2x128xbf16, #tpu.memory_space<vmem>>, vector<1x2x128xbf16>
    %41 = vector.shape_cast %40 : vector<1x2x128xbf16> to vector<2x128xbf16>
    %42 = vector.shape_cast %36 : vector<2x128xbf16> to vector<1x2x128xbf16>
    tpu.vector_store %arg3[%39, %c0_16, %c0_17], %42 {strides = array<i32>} : memref<4x2x128xbf16, #tpu.memory_space<vmem>>, vector<1x2x128xbf16>,
    %c1_i32 = arith.constant 1 : i32
    %c0_18 = arith.constant 0 : index
    %c0_19 = arith.constant 0 : index
    %43 = vector.load %arg4[%c0_18, %c0_19] : memref<2x128xbf16, #tpu.memory_space<vmem>>, vector<2x128xbf16>
    %c0_20 = arith.constant 0 : index
    %c0_21 = arith.constant 0 : index
    %44 = vector.load %arg5[%c0_20, %c0_21] : memref<2x128xf32, #tpu.memory_space<vmem>>, vector<2x128xf32>
    %45 = arith.index_cast %c1_i32 : i32 to index
    %c0_22 = arith.constant 0 : index
    %c0_23 = arith.constant 0 : index
    %46 = vector.load %arg1[%45, %c0_22, %c0_23] : memref<4x2x512xf32, #tpu.memory_space<vmem>>, vector<1x2x512xf32>
    %47 = vector.shape_cast %46 : vector<1x2x512xf32> to vector<2x512xf32>
    %c0_24 = arith.constant 0 : index
    %c0_25 = arith.constant 0 : index
    %48 = vector.load %arg2[%c0_24, %c0_25] : memref<128x512xbf16, #tpu.memory_space<vmem>>, vector<128x512xbf16>
    %cst_26 = arith.constant dense<0.000000e+00> : vector<2x512xf32>
    %49 = tpu.matmul %43, %48, %cst_26 {dimension_numbers = #tpu.dot_dimension_numbers<[1], [0], [0], [1], [0, 0, 1, 1], [], []>} : vector<2x128xbf16>, vector<128x512xbf16>, vector<2x512xf32> -> vector<2x512xf32>
    %50 = arith.addf %47, %49 : vector<2x512xf32>
    %51 = vector.extract_strided_slice %50 {offsets = [0, 0], sizes = [2, 128], strides = [1, 1]} : vector<2x512xf32> to vector<2x128xf32>
    %52 = arith.negf %51 : vector<2x128xf32>
    %53 = math.exp %52 : vector<2x128xf32>
    %cst_27 = arith.constant 1.000000e+00 : f32
    %54 = vector.broadcast %cst_27 : f32 to vector<2x128xf32>
    %55 = arith.addf %54, %53 : vector<2x128xf32>
    %56 = arith.divf %54, %55 : vector<2x128xf32>
    %57 = vector.extract_strided_slice %50 {offsets = [0, 128], sizes = [2, 128], strides = [1, 1]} : vector<2x512xf32> to vector<2x128xf32>
    %58 = arith.negf %57 : vector<2x128xf32>
    %59 = math.exp %58 : vector<2x128xf32>
    %cst_28 = arith.constant 1.000000e+00 : f32
    %60 = vector.broadcast %cst_28 : f32 to vector<2x128xf32>
    %61 = arith.addf %60, %59 : vector<2x128xf32>
    %62 = arith.divf %60, %61 : vector<2x128xf32>
    %63 = vector.extract_strided_slice %50 {offsets = [0, 256], sizes = [2, 128], strides = [1, 1]} : vector<2x512xf32> to vector<2x128xf32>
    %64 = math.tanh %63 : vector<2x128xf32>
    %65 = vector.extract_strided_slice %50 {offsets = [0, 384], sizes = [2, 128], strides = [1, 1]} : vector<2x512xf32> to vector<2x128xf32>
    %66 = arith.negf %65 : vector<2x128xf32>
    %67 = math.exp %66 : vector<2x128xf32>
    %cst_29 = arith.constant 1.000000e+00 : f32
    %68 = vector.broadcast %cst_29 : f32 to vector<2x128xf32>
    %69 = arith.addf %68, %67 : vector<2x128xf32>
    %70 = arith.divf %68, %69 : vector<2x128xf32>
    %71 = arith.mulf %62, %44 : vector<2x128xf32>
    %72 = arith.mulf %56, %64 : vector<2x128xf32>
    %73 = arith.addf %71, %72 : vector<2x128xf32>
    %74 = math.tanh %73 : vector<2x128xf32>
    %75 = arith.mulf %70, %74 : vector<2x128xf32>
    %76 = arith.truncf %75 : vector<2x128xf32> to vector<2x128xbf16>
    %c0_30 = arith.constant 0 : index
    %c0_31 = arith.constant 0 : index
    %77 = vector.load %arg5[%c0_30, %c0_31] : memref<2x128xf32, #tpu.memory_space<vmem>>, vector<2x128xf32>
    tpu.vector_store %arg5[%c0_30, %c0_31], %73 {strides = array<i32>} : memref<2x128xf32, #tpu.memory_space<vmem>>, vector<2x128xf32>,
    %c0_32 = arith.constant 0 : index
    %c0_33 = arith.constant 0 : index
    %78 = vector.load %arg4[%c0_32, %c0_33] : memref<2x128xbf16, #tpu.memory_space<vmem>>, vector<2x128xbf16>
    tpu.vector_store %arg4[%c0_32, %c0_33], %76 {strides = array<i32>} : memref<2x128xbf16, #tpu.memory_space<vmem>>, vector<2x128xbf16>,
    %79 = arith.index_cast %c1_i32 : i32 to index
    %c0_34 = arith.constant 0 : index
    %c0_35 = arith.constant 0 : index
    %80 = vector.load %arg3[%79, %c0_34, %c0_35] : memref<4x2x128xbf16, #tpu.memory_space<vmem>>, vector<1x2x128xbf16>
    %81 = vector.shape_cast %80 : vector<1x2x128xbf16> to vector<2x128xbf16>
    %82 = vector.shape_cast %76 : vector<2x128xbf16> to vector<1x2x128xbf16>
    tpu.vector_store %arg3[%79, %c0_34, %c0_35], %82 {strides = array<i32>} : memref<4x2x128xbf16, #tpu.memory_space<vmem>>, vector<1x2x128xbf16>,
    %c2_i32 = arith.constant 2 : i32
    %c0_36 = arith.constant 0 : index
    %c0_37 = arith.constant 0 : index
    %83 = vector.load %arg4[%c0_36, %c0_37] : memref<2x128xbf16, #tpu.memory_space<vmem>>, vector<2x128xbf16>
    %c0_38 = arith.constant 0 : index
    %c0_39 = arith.constant 0 : index
    %84 = vector.load %arg5[%c0_38, %c0_39] : memref<2x128xf32, #tpu.memory_space<vmem>>, vector<2x128xf32>
    %85 = arith.index_cast %c2_i32 : i32 to index
    %c0_40 = arith.constant 0 : index
    %c0_41 = arith.constant 0 : index
    %86 = vector.load %arg1[%85, %c0_40, %c0_41] : memref<4x2x512xf32, #tpu.memory_space<vmem>>, vector<1x2x512xf32>
    %87 = vector.shape_cast %86 : vector<1x2x512xf32> to vector<2x512xf32>
    %c0_42 = arith.constant 0 : index
    %c0_43 = arith.constant 0 : index
    %88 = vector.load %arg2[%c0_42, %c0_43] : memref<128x512xbf16, #tpu.memory_space<vmem>>, vector<128x512xbf16>
    %cst_44 = arith.constant dense<0.000000e+00> : vector<2x512xf32>
    %89 = tpu.matmul %83, %88, %cst_44 {dimension_numbers = #tpu.dot_dimension_numbers<[1], [0], [0], [1], [0, 0, 1, 1], [], []>} : vector<2x128xbf16>, vector<128x512xbf16>, vector<2x512xf32> -> vector<2x512xf32>
    %90 = arith.addf %87, %89 : vector<2x512xf32>
    %91 = vector.extract_strided_slice %90 {offsets = [0, 0], sizes = [2, 128], strides = [1, 1]} : vector<2x512xf32> to vector<2x128xf32>
    %92 = arith.negf %91 : vector<2x128xf32>
    %93 = math.exp %92 : vector<2x128xf32>
    %cst_45 = arith.constant 1.000000e+00 : f32
    %94 = vector.broadcast %cst_45 : f32 to vector<2x128xf32>
    %95 = arith.addf %94, %93 : vector<2x128xf32>
    %96 = arith.divf %94, %95 : vector<2x128xf32>
    %97 = vector.extract_strided_slice %90 {offsets = [0, 128], sizes = [2, 128], strides = [1, 1]} : vector<2x512xf32> to vector<2x128xf32>
    %98 = arith.negf %97 : vector<2x128xf32>
    %99 = math.exp %98 : vector<2x128xf32>
    %cst_46 = arith.constant 1.000000e+00 : f32
    %100 = vector.broadcast %cst_46 : f32 to vector<2x128xf32>
    %101 = arith.addf %100, %99 : vector<2x128xf32>
    %102 = arith.divf %100, %101 : vector<2x128xf32>
    %103 = vector.extract_strided_slice %90 {offsets = [0, 256], sizes = [2, 128], strides = [1, 1]} : vector<2x512xf32> to vector<2x128xf32>
    %104 = math.tanh %103 : vector<2x128xf32>
    %105 = vector.extract_strided_slice %90 {offsets = [0, 384], sizes = [2, 128], strides = [1, 1]} : vector<2x512xf32> to vector<2x128xf32>
    %106 = arith.negf %105 : vector<2x128xf32>
    %107 = math.exp %106 : vector<2x128xf32>
    %cst_47 = arith.constant 1.000000e+00 : f32
    %108 = vector.broadcast %cst_47 : f32 to vector<2x128xf32>
    %109 = arith.addf %108, %107 : vector<2x128xf32>
    %110 = arith.divf %108, %109 : vector<2x128xf32>
    %111 = arith.mulf %102, %84 : vector<2x128xf32>
    %112 = arith.mulf %96, %104 : vector<2x128xf32>
    %113 = arith.addf %111, %112 : vector<2x128xf32>
    %114 = math.tanh %113 : vector<2x128xf32>
    %115 = arith.mulf %110, %114 : vector<2x128xf32>
    %116 = arith.truncf %115 : vector<2x128xf32> to vector<2x128xbf16>
    %c0_48 = arith.constant 0 : index
    %c0_49 = arith.constant 0 : index
    %117 = vector.load %arg5[%c0_48, %c0_49] : memref<2x128xf32, #tpu.memory_space<vmem>>, vector<2x128xf32>
    tpu.vector_store %arg5[%c0_48, %c0_49], %113 {strides = array<i32>} : memref<2x128xf32, #tpu.memory_space<vmem>>, vector<2x128xf32>,
    %c0_50 = arith.constant 0 : index
    %c0_51 = arith.constant 0 : index
    %118 = vector.load %arg4[%c0_50, %c0_51] : memref<2x128xbf16, #tpu.memory_space<vmem>>, vector<2x128xbf16>
    tpu.vector_store %arg4[%c0_50, %c0_51], %116 {strides = array<i32>} : memref<2x128xbf16, #tpu.memory_space<vmem>>, vector<2x128xbf16>,
    %119 = arith.index_cast %c2_i32 : i32 to index
    %c0_52 = arith.constant 0 : index
    %c0_53 = arith.constant 0 : index
    %120 = vector.load %arg3[%119, %c0_52, %c0_53] : memref<4x2x128xbf16, #tpu.memory_space<vmem>>, vector<1x2x128xbf16>
    %121 = vector.shape_cast %120 : vector<1x2x128xbf16> to vector<2x128xbf16>
    %122 = vector.shape_cast %116 : vector<2x128xbf16> to vector<1x2x128xbf16>
    tpu.vector_store %arg3[%119, %c0_52, %c0_53], %122 {strides = array<i32>} : memref<4x2x128xbf16, #tpu.memory_space<vmem>>, vector<1x2x128xbf16>,
    %c3_i32 = arith.constant 3 : i32
    %c0_54 = arith.constant 0 : index
    %c0_55 = arith.constant 0 : index
    %123 = vector.load %arg4[%c0_54, %c0_55] : memref<2x128xbf16, #tpu.memory_space<vmem>>, vector<2x128xbf16>
    %c0_56 = arith.constant 0 : index
    %c0_57 = arith.constant 0 : index
    %124 = vector.load %arg5[%c0_56, %c0_57] : memref<2x128xf32, #tpu.memory_space<vmem>>, vector<2x128xf32>
    %125 = arith.index_cast %c3_i32 : i32 to index
    %c0_58 = arith.constant 0 : index
    %c0_59 = arith.constant 0 : index
    %126 = vector.load %arg1[%125, %c0_58, %c0_59] : memref<4x2x512xf32, #tpu.memory_space<vmem>>, vector<1x2x512xf32>
    %127 = vector.shape_cast %126 : vector<1x2x512xf32> to vector<2x512xf32>
    %c0_60 = arith.constant 0 : index
    %c0_61 = arith.constant 0 : index
    %128 = vector.load %arg2[%c0_60, %c0_61] : memref<128x512xbf16, #tpu.memory_space<vmem>>, vector<128x512xbf16>
    %cst_62 = arith.constant dense<0.000000e+00> : vector<2x512xf32>
    %129 = tpu.matmul %123, %128, %cst_62 {dimension_numbers = #tpu.dot_dimension_numbers<[1], [0], [0], [1], [0, 0, 1, 1], [], []>} : vector<2x128xbf16>, vector<128x512xbf16>, vector<2x512xf32> -> vector<2x512xf32>
    %130 = arith.addf %127, %129 : vector<2x512xf32>
    %131 = vector.extract_strided_slice %130 {offsets = [0, 0], sizes = [2, 128], strides = [1, 1]} : vector<2x512xf32> to vector<2x128xf32>
    %132 = arith.negf %131 : vector<2x128xf32>
    %133 = math.exp %132 : vector<2x128xf32>
    %cst_63 = arith.constant 1.000000e+00 : f32
    %134 = vector.broadcast %cst_63 : f32 to vector<2x128xf32>
    %135 = arith.addf %134, %133 : vector<2x128xf32>
    %136 = arith.divf %134, %135 : vector<2x128xf32>
    %137 = vector.extract_strided_slice %130 {offsets = [0, 128], sizes = [2, 128], strides = [1, 1]} : vector<2x512xf32> to vector<2x128xf32>
    %138 = arith.negf %137 : vector<2x128xf32>
    %139 = math.exp %138 : vector<2x128xf32>
    %cst_64 = arith.constant 1.000000e+00 : f32
    %140 = vector.broadcast %cst_64 : f32 to vector<2x128xf32>
    %141 = arith.addf %140, %139 : vector<2x128xf32>
    %142 = arith.divf %140, %141 : vector<2x128xf32>
    %143 = vector.extract_strided_slice %130 {offsets = [0, 256], sizes = [2, 128], strides = [1, 1]} : vector<2x512xf32> to vector<2x128xf32>
    %144 = math.tanh %143 : vector<2x128xf32>
    %145 = vector.extract_strided_slice %130 {offsets = [0, 384], sizes = [2, 128], strides = [1, 1]} : vector<2x512xf32> to vector<2x128xf32>
    %146 = arith.negf %145 : vector<2x128xf32>
    %147 = math.exp %146 : vector<2x128xf32>
    %cst_65 = arith.constant 1.000000e+00 : f32
    %148 = vector.broadcast %cst_65 : f32 to vector<2x128xf32>
    %149 = arith.addf %148, %147 : vector<2x128xf32>
    %150 = arith.divf %148, %149 : vector<2x128xf32>
    %151 = arith.mulf %142, %124 : vector<2x128xf32>
    %152 = arith.mulf %136, %144 : vector<2x128xf32>
    %153 = arith.addf %151, %152 : vector<2x128xf32>
    %154 = math.tanh %153 : vector<2x128xf32>
    %155 = arith.mulf %150, %154 : vector<2x128xf32>
    %156 = arith.truncf %155 : vector<2x128xf32> to vector<2x128xbf16>
    %c0_66 = arith.constant 0 : index
    %c0_67 = arith.constant 0 : index
    %157 = vector.load %arg5[%c0_66, %c0_67] : memref<2x128xf32, #tpu.memory_space<vmem>>, vector<2x128xf32>
    tpu.vector_store %arg5[%c0_66, %c0_67], %153 {strides = array<i32>} : memref<2x128xf32, #tpu.memory_space<vmem>>, vector<2x128xf32>,
    %c0_68 = arith.constant 0 : index
    %c0_69 = arith.constant 0 : index
    %158 = vector.load %arg4[%c0_68, %c0_69] : memref<2x128xbf16, #tpu.memory_space<vmem>>, vector<2x128xbf16>
    tpu.vector_store %arg4[%c0_68, %c0_69], %156 {strides = array<i32>} : memref<2x128xbf16, #tpu.memory_space<vmem>>, vector<2x128xbf16>,
    %159 = arith.index_cast %c3_i32 : i32 to index
    %c0_70 = arith.constant 0 : index
    %c0_71 = arith.constant 0 : index
    %160 = vector.load %arg3[%159, %c0_70, %c0_71] : memref<4x2x128xbf16, #tpu.memory_space<vmem>>, vector<1x2x128xbf16>
    %161 = vector.shape_cast %160 : vector<1x2x128xbf16> to vector<2x128xbf16>
    %162 = vector.shape_cast %156 : vector<2x128xbf16> to vector<1x2x128xbf16>
    tpu.vector_store %arg3[%159, %c0_70, %c0_71], %162 {strides = array<i32>} : memref<4x2x128xbf16, #tpu.memory_space<vmem>>, vector<1x2x128xbf16>,
    %c4_i32 = arith.constant 4 : i32
    return
  }
  func.func @transform_0(%arg0: i32) -> (i32, i32, i32) {
    %c0_i32 = arith.constant 0 : i32
    %c0_i32_0 = arith.constant 0 : i32
    %c0_i32_1 = arith.constant 0 : i32
    return %arg0, %c0_i32, %c0_i32_0 : i32, i32, i32
  }
  func.func @transform_1(%arg0: i32) -> (i32, i32) {
    %c0_i32 = arith.constant 0 : i32
    %c0_i32_0 = arith.constant 0 : i32
    %c0_i32_1 = arith.constant 0 : i32
    return %c0_i32, %c0_i32_0 : i32, i32
  }
  func.func @transform_2(%arg0: i32) -> (i32, i32, i32) {
    %c0_i32 = arith.constant 0 : i32
    %c0_i32_0 = arith.constant 0 : i32
    %c0_i32_1 = arith.constant 0 : i32
    return %arg0, %c0_i32, %c0_i32_0 : i32, i32, i32
  }
}

</mosaic_0001>

<bundles_post_ra>
// kernel: _lambda_.3
= control target key start
LH: loop header
LB: loop body
LE: loop exit
PB: predicated region body
PF: predicated region fallthrough
CT: control target
= control target key end

     0   :  { %s661_s12 = smov 0   ;;  %s663_s13 = smov 0   ;;  %s754_s0 = inlined_call_operand.vmem [shape: bf16[18,128], index: 0, kind: input, shape index: {}]   ;;  %s755_s1 = inlined_call_operand.vmem [shape: bf16[128,256], index: 1, kind: input, shape index: {}]   ;;  %s756_s2 = inlined_call_operand.vmem [shape: f32[1,256], index: 2, kind: input, shape index: {}]   ;;  %s757_s3 = inlined_call_operand.vmem [shape: f32[18,256], index: 3, kind: output, shape index: {}]  }
   0x1   :  { %s665_s14 = smov 0  }
   0x2 LB: > { %s677_s15 = sadd.s32 4294967295, %s639_s14   ;;  %s680_s16 = sadd.s32 1, %s639_s14   ;;  %s639_s14 = sphi %s665_s14, %s761_s14   ;;  %s635_s13 = sphi %s663_s13, %s760_s13   ;;  %s631_s12 = sphi %s661_s12, %s759_s12  }
   0x3   : > { %s38_s17 = ssub.s32 %s639_s14, %s680_s16  ;;  %s41_s18 = sadd.s32 1, %s635_s13 }
   0x4   : > { %p39_p0 = scmp.eq.s32.totalorder %s38_s17, 0  ;;  %p48_p1 = scmp.ne.s32.totalorder %s635_s13, %s631_s12 }
   0x5   : > { %p49_p2 = scmp.eq.s32.totalorder %s639_s14, 0  ;;  %p104_p3 = scmp.eq.s32.totalorder %s677_s15, 1 }
   0x6   : > { %s690_s19 = scalar_select %p39_p0, %s635_s13, %s41_s18  }
   0x7   : > { %p50_p4 = por %p49_p2, %p48_p1  ;;  %p692_p5 = por %p104_p3, %p48_p1 }
   0x8   : > { %p533_p6 = scmp.ge.s32.totalorder %s639_s14, 2 }
   0xa   : > { %129 = sbr.rel (%p533_p6) target bundleno = 31 (0x1f), region = 20 }
  0x11   : > { %132 = sbr.rel (!%p50_p4) target bundleno = 31 (0x1f), region = 24  ;;  %s134_s21 = sand.u32 (%p50_p4), 1, %s635_s13  }
  0x12   : > { %s535_s22 = sshll.u32 (%p50_p4), %s639_s14, 2  ;;  %s534_s23 = sshll.u32 (%p50_p4), %s134_s21, 6 }
  0x13   : > { %s702_s26 = scalar_lea.vmem (%p50_p4), %s755_s1, %s535_s22  ;;  %s136_s27 = scalar_lea.vmem (%p50_p4), [#allocation2], %s534_s23 }
  0x14   : > { %v154_v0 = vld [vmem:[%s702_s26] sm:$0xf] (%p50_p4)  ;;  %v156_v1 = vld [vmem:[%s702_s26 + $0x8] sm:$0xf] (%p50_p4)  ;;  %v158_v2 = vld [vmem:[%s702_s26 + $0x10] sm:$0xf] (%p50_p4) }
  0x15   : > { %155 = vst [vmem:[%s136_s27] sm:$0xf] (%p50_p4), %v154_v0  ;;  %157 = vst [vmem:[%s136_s27 + $0x4] sm:$0xf] (%p50_p4), %v156_v1  ;;  %v160_v3 = vld [vmem:[%s702_s26 + $0x18] sm:$0xf] (%p50_p4) }
  0x16   : > { %v162_v4 = vld [vmem:[%s702_s26 + $0x20] sm:$0xf] (%p50_p4)  ;;  %159 = vst [vmem:[%s136_s27 + $0x8] sm:$0xf] (%p50_p4), %v158_v2  ;;  %161 = vst [vmem:[%s136_s27 + $0xc] sm:$0xf] (%p50_p4), %v160_v3 }
  0x17   : > { %163 = vst [vmem:[%s136_s27 + $0x10] sm:$0xf] (%p50_p4), %v162_v4  ;;  %v164_v5 = vld [vmem:[%s702_s26 + $0x28] sm:$0xf] (%p50_p4)  ;;  %v166_v6 = vld [vmem:[%s702_s26 + $0x30] sm:$0xf] (%p50_p4) }
  0x18   : > { %v168_v7 = vld [vmem:[%s702_s26 + $0x38] sm:$0xf]  ;;  %165 = vst [vmem:[%s136_s27 + $0x14] sm:$0xf] %v164_v5  ;;  %167 = vst [vmem:[%s136_s27 + $0x18] sm:$0xf] %v166_v6 }
  0x19   : > { %169 = vst [vmem:[%s136_s27 + $0x1c] sm:$0xf] %v168_v7  ;;  %v170_v8 = vld [vmem:[%s702_s26 + $0x40] sm:$0xf]  ;;  %v172_v9 = vld [vmem:[%s702_s26 + $0x48] sm:$0xf] }
  0x1a   : > { %v174_v10 = vld [vmem:[%s702_s26 + $0x50] sm:$0xf]  ;;  %171 = vst [vmem:[%s136_s27 + $0x20] sm:$0xf] %v170_v8  ;;  %173 = vst [vmem:[%s136_s27 + $0x24] sm:$0xf] %v172_v9 }
  0x1b   : > { %175 = vst [vmem:[%s136_s27 + $0x28] sm:$0xf] %v174_v10  ;;  %v176_v11 = vld [vmem:[%s702_s26 + $0x58] sm:$0xf]  ;;  %v178_v12 = vld [vmem:[%s702_s26 + $0x60] sm:$0xf] }
  0x1c   : > { %v180_v13 = vld [vmem:[%s702_s26 + $0x68] sm:$0xf]  ;;  %177 = vst [vmem:[%s136_s27 + $0x2c] sm:$0xf] %v176_v11  ;;  %179 = vst [vmem:[%s136_s27 + $0x30] sm:$0xf] %v178_v12 }
  0x1d   : > { %181 = vst [vmem:[%s136_s27 + $0x34] sm:$0xf] %v180_v13  ;;  %v182_v14 = vld [vmem:[%s702_s26 + $0x70] sm:$0xf]  ;;  %v184_v15 = vld [vmem:[%s702_s26 + $0x78] sm:$0xf] }
  0x1e   : > { %183 = vst [vmem:[%s136_s27 + $0x38] sm:$0xf] %v182_v14  ;;  %185 = vst [vmem:[%s136_s27 + $0x3c] sm:$0xf] %v184_v15 }
  0x1f PF: > { %p536_p7 = scmp.ge.s32.totalorder %s639_s14, 1  ;;  %p245_p8 = scmp.lt.s32.totalorder %s639_s14, 3 }
  0x21   : > { %p246_p9 = pnand %p536_p7, %p245_p8 }
  0x22   : > { %s252_s28 = sand.u32 (!%p246_p9), 1, %s631_s12   ;;  %v615_v16 = vld [vmem:[%s754_s0] sm:$0xff] (!%p246_p9)   ;;  %v616_v25 = vld [vmem:[%s754_s0 + $0x8] ss:$0 sps:$4 sm:$0x11] (!%p246_p9)   ;;  %p277_p10 = scmp.lt.s32.totalorder (!%p246_p9), %s677_s15, 1 }
  0x23   : > { %249 = sbr.rel (%p246_p9) target bundleno = 296 (0x128), region = 69  ;;  %s537_s4 = sshll.u32 (!%p246_p9), %s252_s28, 6  ;;  %578 = vmatprep.mubr.bf16.mxu0 (!%p246_p9), %v615_v16 }
  0x24   : > { %s254_s5 = scalar_lea.vmem (!%p246_p9), [#allocation2], %s537_s4  ;;  %s582_s14 = smul.u32 (!%p246_p9), 24, %s252_s28 }
  0x25   : > { %v607_v17 = vld [vmem:[%s254_s5] sm:$0xff] (!%p246_p9)   ;;  %v608_v18 = vld [vmem:[%s254_s5 + $0x8] sm:$0xff] (!%p246_p9)   ;;  %v609_v19 = vld [vmem:[%s254_s5 + $0x10] sm:$0xff] (!%p246_p9)  }
  0x26   : > { %562 = vmatprep.subr.bf16.mxu0 (!%p246_p9), %v607_v17  ;;  %v610_v20 = vld [vmem:[%s254_s5 + $0x18] sm:$0xff] (!%p246_p9)   ;;  %v611_v21 = vld [vmem:[%s254_s5 + $0x20] sm:$0xff] (!%p246_p9)   ;;  %v612_v22 = vld [vmem:[%s254_s5 + $0x28] sm:$0xff] (!%p246_p9)   ;;  %s276_s17 = scalar_lea.vmem (!%p246_p9), [#allocation3], %s582_s14 }
  0x27   : > { %563 = vmatpush3.bf16.msra.mxu0 (!%p246_p9), %v607_v17  ;;  %v613_v23 = vld [vmem:[%s254_s5 + $0x30] sm:$0xff] (!%p246_p9)   ;;  %v614_v24 = vld [vmem:[%s254_s5 + $0x38] sm:$0xff] (!%p246_p9)  }
  0x28   : > { %564 = vmatprep.subr.bf16.mxu0 (!%p246_p9), %v608_v18 }
  0x2a   : > { %s278_s8 = scalar_select %p277_p10, %s677_s15, 1 }
  0x2b   : > { %565 = vmatpush3.bf16.msra.mxu0 %v608_v18  ;;  %s549_s18 = sshll.u32 (%p692_p5), %s677_s15, 3 }
  0x2c   : > { %566 = vmatprep.subr.bf16.mxu0 %v609_v19  ;;  %s279_s11 = scalar_lea.vmem %s756_s2, %s278_s8  ;;  %s424_s22 = scalar_lea.vmem (%p692_p5), %s757_s3, %s549_s18 }
  0x2d   : > { %v538_v26 = vld [vmem:[%s279_s11] ss:$0 sm:$0xff] }
  0x2f   : > { %567 = vmatpush3.bf16.msra.mxu0 %v609_v19 }
  0x30   : > { %568 = vmatprep.subr.bf16.mxu0 %v610_v20 }
  0x33   : > { %569 = vmatpush3.bf16.msra.mxu0 %v610_v20 }
  0x34   : > { %570 = vmatprep.subr.bf16.mxu0 %v611_v21 }
  0x37   : > { %571 = vmatpush3.bf16.msra.mxu0 %v611_v21 }
  0x38   : > { %572 = vmatprep.subr.bf16.mxu0 %v612_v22 }
  0x3b   : > { %573 = vmatpush3.bf16.msra.mxu0 %v612_v22 }
  0x3c   : > { %574 = vmatprep.subr.bf16.mxu0 %v613_v23 }
  0x3f   : > { %575 = vmatpush3.bf16.msra.mxu0 %v613_v23 }
  0x40   : > { %576 = vmatprep.subr.bf16.mxu0 %v614_v24 }
  0x43   : > { %577 = vmatpush3.bf16.msra.mxu0 %v614_v24 }
  0x46   : > { %579 = vmatmul.mubr.bf16.vlgmr.msra.gmra.mrb[0].mxu0 %v616_v25 }
 0x119   : > { %v580_v27 = vpop.f32.mrb[0].mxu0  ;;  %422 = sbr.rel (!%p692_p5) target bundleno = 296 (0x128), region = 77 }
 0x11a   : > { %v408_v28 = vadd.f32 %v580_v27, %v538_v26  ;;  %v399_v29 = vpop.f32.mrb[1].mxu0 }
 0x11b   : > { %v400_v30 = vadd.f32 %v538_v26, %v399_v29  ;;  %v581_v31 = vpop.f32.mrb[2].mxu0 }
 0x11c   : > { %415 = vst [vmem:[%s276_s17 + $0x10] sm:$0x3] %v408_v28  ;;  %v402_v32 = vpop.f32.mrb[3].mxu0 }
 0x11d   : > { %413 = vst [vmem:[%s276_s17] sm:$0xff] %v400_v30  ;;  %v403_v33 = vadd.f32 %v538_v26, %v402_v32 }
 0x11f   : > { %414 = vst [vmem:[%s276_s17 + $0x8] sm:$0xff] %v403_v33 }
 0x123   : > { %v460_v36 = vld [vmem:[%s276_s17 + $0x10] sm:$0xff] }
 0x124   : > { %v456_v34 = vld [vmem:[%s276_s17] sm:$0xff]  ;;  %461 = vst [vmem:[%s424_s22 + $0x20] sm:$0xff] %v460_v36 }
 0x125   : > { %457 = vst [vmem:[%s424_s22] sm:$0xff] %v456_v34 }
 0x126   : > { %v458_v35 = vld [vmem:[%s276_s17 + $0x8] sm:$0xff] }
 0x127   : > { %459 = vst [vmem:[%s424_s22 + $0x10] sm:$0xff] %v458_v35 }
 0x128 PF: > { %p10_p11 = scmp.ge.s32.totalorder %s680_s16, 4   ;;  %s759_s12 = smov %s635_s13 }
 0x129   : > { %s760_s13 = smov %s690_s19  ;;  %s761_s14 = smov %s680_s16 }
 0x12a   :  { %12 = sbr.rel (!%p10_p11) target bundleno = 2 (0x2), region = 149 }

// kernel: _lambda_.2
= control target key start
LH: loop header
LB: loop body
LE: loop exit
PB: predicated region body
PF: predicated region fallthrough
CT: control target
= control target key end

     0   :  { %s1861_s9 = smov 0   ;;  %s2196_s0 = inlined_call_operand.vmem [shape: f32[12,2,512], index: 0, kind: input, shape index: {}]   ;;  %s2197_s1 = inlined_call_operand.vmem [shape: bf16[128,512], index: 1, kind: input, shape index: {}]   ;;  %s2198_s2 = inlined_call_operand.vmem [shape: bf16[12,2,128], index: 2, kind: output, shape index: {}]  }
   0x1 LB: > { %s1551_s10 = sadd.s32 4294967295, %s1840_s9   ;;  %p1555_p0 = scmp.ge.s32.totalorder %s1840_s9, 1  ;;  %s1840_s9 = sphi %s1861_s9, %s12_s9  }
   0x2   : > { %p114_p1 = scmp.lt.s32.totalorder %s1840_s9, 4 }
   0x4   : > { %p115_p2 = pnand %p1555_p0, %p114_p1 }
   0x5   : > { %s1556_s11 = sshll.u32 (!%p115_p2), %s1551_s10, 2  ;;  %p1560_p4 = scmp.ne.s32.totalorder (!%p115_p2), %s1551_s10, 0 }
   0x6   : > { %118 = sbr.rel (%p115_p2) target bundleno = 1151 (0x47f), region = 28  ;;  %p137_p3 = scmp.lt.s32.totalorder (!%p115_p2), %s1556_s11, 11 }
   0xd   : > { %s2200_s11 = smov (!%p137_p3, %s1556_s11), 11  ;;  %152 = sbr.rel (%p1560_p4) target bundleno = 20 (0x14), region = 32 }
   0xe   : > { %s1709_s12 = sshll.u32 %s2200_s11, 3  ;;  %s1872_s15 = scalar_lea.vmem %s2198_s2, %s2200_s11  ;;  %v1842_v0 = vmov (!%p1560_p4), 0   ;;  %v1843_v1 = vmov (!%p1560_p4), 0.0  }
   0xf   : > { %s1877_s18 = scalar_lea.vmem %s2196_s0, %s1709_s12  ;;  %153 = vst [vmem:[#allocation2] sm:$0x1] (!%p1560_p4), %v1842_v0  ;;  %154 = vst [vmem:[#allocation3] sm:$0x3] (!%p1560_p4), %v1843_v1 }
  0x14 PF: > { %v1882_v2 = vld [vmem:[%s2197_s1 + $0x4] ss:$16 sps:$4 sm:$0xff]   ;;  %v1887_v3 = vld [vmem:[%s2197_s1 + $0xc] ss:$16 sps:$4 sm:$0xff]   ;;  %v1844_v4 = vmov 0   ;;  %v441_v38 = vlaneseq }
  0x15   : > { %382 = vmatprep.mubr.bf16.mxu0 %v1844_v4  ;;  %423 = vmatprep.mubr.bf16.mxu1 %v1844_v4  ;;  %v1895_v5 = vld [vmem:[%s2197_s1] ss:$16 sps:$4 sm:$0xff]   ;;  %v1900_v6 = vld [vmem:[%s2197_s1 + $0x8] ss:$16 sps:$4 sm:$0xff]   ;;  %v1906_v7 = vld [vmem:[%s2197_s1 + $0x24] ss:$16 sps:$4 sm:$0xff]  }
  0x16   : > { %350 = vmatprep.subr.bf16.mxu0 %v1882_v2  ;;  %391 = vmatprep.subr.bf16.mxu1 %v1887_v3  ;;  %v1913_v8 = vld [vmem:[%s2197_s1 + $0x2c] ss:$16 sps:$4 sm:$0xff]   ;;  %v1918_v9 = vld [vmem:[%s2197_s1 + $0x20] ss:$16 sps:$4 sm:$0xff]   ;;  %v1924_v10 = vld [vmem:[%s2197_s1 + $0x28] ss:$16 sps:$4 sm:$0xff]  }
  0x17   : > { %351 = vmatpush1.bf16.msra.mxu0 %v1895_v5  ;;  %392 = vmatpush1.bf16.msra.mxu1 %v1900_v6  ;;  %v1930_v11 = vld [vmem:[%s2197_s1 + $0x44] ss:$16 sps:$4 sm:$0xff]   ;;  %v1935_v12 = vld [vmem:[%s2197_s1 + $0x4c] ss:$16 sps:$4 sm:$0xff]   ;;  %v1940_v13 = vld [vmem:[%s2197_s1 + $0x40] ss:$16 sps:$4 sm:$0xff]  }
  0x18   : > { %352 = vmatprep.subr.bf16.mxu0 %v1906_v7  ;;  %393 = vmatprep.subr.bf16.mxu1 %v1913_v8  ;;  %v1945_v14 = vld [vmem:[%s2197_s1 + $0x48] ss:$16 sps:$4 sm:$0xff]   ;;  %v1952_v15 = vld [vmem:[%s2197_s1 + $0x64] ss:$16 sps:$4 sm:$0xff]   ;;  %v1959_v16 = vld [vmem:[%s2197_s1 + $0x6c] ss:$16 sps:$4 sm:$0xff]  }
  0x19   : > { %v1964_v17 = vld [vmem:[%s2197_s1 + $0x60] ss:$16 sps:$4 sm:$0xff]   ;;  %v1971_v18 = vld [vmem:[%s2197_s1 + $0x68] ss:$16 sps:$4 sm:$0xff]   ;;  %v1976_v19 = vld [vmem:[%s2197_s1 + $0x84] ss:$16 sps:$4 sm:$0xff]  }
  0x1a   : > { %v1983_v20 = vld [vmem:[%s2197_s1 + $0x8c] ss:$16 sps:$4 sm:$0xff]   ;;  %v1988_v21 = vld [vmem:[%s2197_s1 + $0x80] ss:$16 sps:$4 sm:$0xff]   ;;  %v1993_v22 = vld [vmem:[%s2197_s1 + $0x88] ss:$16 sps:$4 sm:$0xff]  }
  0x1b   : > { %353 = vmatpush1.bf16.msra.mxu0 %v1918_v9  ;;  %394 = vmatpush1.bf16.msra.mxu1 %v1924_v10  ;;  %v2000_v23 = vld [vmem:[%s2197_s1 + $0xa4] ss:$16 sps:$4 sm:$0xff]   ;;  %v2007_v24 = vld [vmem:[%s2197_s1 + $0xac] ss:$16 sps:$4 sm:$0xff]   ;;  %v2014_v25 = vld [vmem:[%s2197_s1 + $0xa0] ss:$16 sps:$4 sm:$0xff]  }
  0x1c   : > { %354 = vmatprep.subr.bf16.mxu0 %v1930_v11  ;;  %395 = vmatprep.subr.bf16.mxu1 %v1935_v12  ;;  %v2019_v26 = vld [vmem:[%s2197_s1 + $0xa8] ss:$16 sps:$4 sm:$0xff]   ;;  %v2026_v27 = vld [vmem:[%s2197_s1 + $0xc4] ss:$16 sps:$4 sm:$0xff]   ;;  %v2031_v28 = vld [vmem:[%s2197_s1 + $0xcc] ss:$16 sps:$4 sm:$0xff]  }
  0x1d   : > { %v2038_v29 = vld [vmem:[%s2197_s1 + $0xc0] ss:$16 sps:$4 sm:$0xff]   ;;  %v2043_v30 = vld [vmem:[%s2197_s1 + $0xc8] ss:$16 sps:$4 sm:$0xff]   ;;  %v2050_v31 = vld [vmem:[%s2197_s1 + $0xe4] ss:$16 sps:$4 sm:$0xff]  }
  0x1e   : > { %v2055_v32 = vld [vmem:[%s2197_s1 + $0xec] ss:$16 sps:$4 sm:$0xff]   ;;  %v2062_v33 = vld [vmem:[%s2197_s1 + $0xe0] ss:$16 sps:$4 sm:$0xff]   ;;  %v2067_v34 = vld [vmem:[%s2197_s1 + $0xe8] ss:$16 sps:$4 sm:$0xff]  }
  0x1f   : > { %355 = vmatpush1.bf16.msra.mxu0 %v1940_v13  ;;  %396 = vmatpush1.bf16.msra.mxu1 %v1945_v14  ;;  %v155_v35 = vld [vmem:[#allocation2] sm:$0x1]  ;;  %v1845_v36 = vmov 1983009808   ;;  %v442_v40 = vshrl.u32 %v441_v38, 7 }
  0x20   : > { %356 = vmatprep.subr.bf16.mxu0 %v1952_v15  ;;  %397 = vmatprep.subr.bf16.mxu1 %v1959_v16  ;;  %v439_v37 = vunpack.c.l.s4 %v1845_v36  ;;  %v157_v54 = vld [vmem:[%s1877_s18] sm:$0xff] }
  0x21   : > { %v156_v38 = vld [vmem:[#allocation3] sm:$0x3] }
  0x22   : > { %v440_v39 = vunpack.c.0.s8 %v439_v37 }
  0x23   : > { %357 = vmatpush1.bf16.msra.mxu0 %v1964_v17  ;;  %398 = vmatpush1.bf16.msra.mxu1 %v1971_v18 }
  0x24   : > { %358 = vmatprep.subr.bf16.mxu0 %v1976_v19  ;;  %399 = vmatprep.subr.bf16.mxu1 %v1983_v20  ;;  %v2109_v43 = vsub.s32 %v440_v39, %v442_v40 }
  0x27   : > { %359 = vmatpush1.bf16.msra.mxu0 %v1988_v21  ;;  %400 = vmatpush1.bf16.msra.mxu1 %v1993_v22 }
  0x28   : > { %360 = vmatprep.subr.bf16.mxu0 %v2000_v23  ;;  %401 = vmatprep.subr.bf16.mxu1 %v2007_v24 }
  0x2b   : > { %361 = vmatpush1.bf16.msra.mxu0 %v2014_v25  ;;  %402 = vmatpush1.bf16.msra.mxu1 %v2019_v26 }
  0x2c   : > { %362 = vmatprep.subr.bf16.mxu0 %v2026_v27  ;;  %403 = vmatprep.subr.bf16.mxu1 %v2031_v28 }
  0x2f   : > { %363 = vmatpush1.bf16.msra.mxu0 %v2038_v29  ;;  %404 = vmatpush1.bf16.msra.mxu1 %v2043_v30 }
  0x30   : > { %364 = vmatprep.subr.bf16.mxu0 %v2050_v31  ;;  %405 = vmatprep.subr.bf16.mxu1 %v2055_v32 }
  0x33   : > { %365 = vmatpush1.bf16.msra.mxu0 %v2062_v33  ;;  %406 = vmatpush1.bf16.msra.mxu1 %v2067_v34 }
  0x34   : > { %686 = vmatprep.subr.bf16.mxu0 %v1882_v2  ;;  %727 = vmatprep.subr.bf16.mxu1 %v1887_v3 }
  0x36   : > { %383 = vmatmul.mubr.bf16.vlgmr.msra.gmra.mrb[0].mxu0 %v155_v35  ;;  %424 = vmatmul.mubr.bf16.vlgmr.msra.gmra.mrb[0].mxu1 %v155_v35 }
  0x37   : > { %687 = vmatpush1.bf16.msra.mxu0 %v1895_v5  ;;  %728 = vmatpush1.bf16.msra.mxu1 %v1900_v6 }
  0x38   : > { %688 = vmatprep.subr.bf16.mxu0 %v1906_v7  ;;  %729 = vmatprep.subr.bf16.mxu1 %v1913_v8 }
  0x39   : > { %718 = vmatprep.mubr.bf16.mxu0 %v1844_v4  ;;  %759 = vmatprep.mubr.bf16.mxu1 %v1844_v4 }
  0x3b   : > { %689 = vmatpush1.bf16.msra.mxu0 %v1918_v9  ;;  %730 = vmatpush1.bf16.msra.mxu1 %v1924_v10 }
  0x3c   : > { %690 = vmatprep.subr.bf16.mxu0 %v1930_v11  ;;  %731 = vmatprep.subr.bf16.mxu1 %v1935_v12 }
  0x3f   : > { %691 = vmatpush1.bf16.msra.mxu0 %v1940_v13  ;;  %732 = vmatpush1.bf16.msra.mxu1 %v1945_v14 }
  0x40   : > { %692 = vmatprep.subr.bf16.mxu0 %v1952_v15  ;;  %733 = vmatprep.subr.bf16.mxu1 %v1959_v16 }
  0x43   : > { %693 = vmatpush1.bf16.msra.mxu0 %v1964_v17  ;;  %734 = vmatpush1.bf16.msra.mxu1 %v1971_v18 }
  0x44   : > { %694 = vmatprep.subr.bf16.mxu0 %v1976_v19  ;;  %735 = vmatprep.subr.bf16.mxu1 %v1983_v20 }
  0x47   : > { %695 = vmatpush1.bf16.msra.mxu0 %v1988_v21  ;;  %736 = vmatpush1.bf16.msra.mxu1 %v1993_v22 }
  0x48   : > { %696 = vmatprep.subr.bf16.mxu0 %v2000_v23  ;;  %737 = vmatprep.subr.bf16.mxu1 %v2007_v24 }
  0x4b   : > { %697 = vmatpush1.bf16.msra.mxu0 %v2014_v25  ;;  %738 = vmatpush1.bf16.msra.mxu1 %v2019_v26 }
  0x4c   : > { %698 = vmatprep.subr.bf16.mxu0 %v2026_v27  ;;  %739 = vmatprep.subr.bf16.mxu1 %v2031_v28 }
  0x4f   : > { %699 = vmatpush1.bf16.msra.mxu0 %v2038_v29  ;;  %740 = vmatpush1.bf16.msra.mxu1 %v2043_v30 }
  0x50   : > { %700 = vmatprep.subr.bf16.mxu0 %v2050_v31  ;;  %741 = vmatprep.subr.bf16.mxu1 %v2055_v32 }
  0x53   : > { %701 = vmatpush1.bf16.msra.mxu0 %v2062_v33  ;;  %742 = vmatpush1.bf16.msra.mxu1 %v2067_v34 }
  0x54   : > { %1023 = vmatprep.subr.bf16.mxu0 %v1882_v2  ;;  %1064 = vmatprep.subr.bf16.mxu1 %v1887_v3 }
 0x109   : > { %v384_v41 = vpop.f32.mrb[0].mxu0  ;;  %v425_v42 = vpop.f32.mrb[0].mxu1 }
 0x10a   : > { %v386_v44 = vpop.f32.mrb[1].mxu0  ;;  %v427_v45 = vpop.f32.mrb[1].mxu1 }
 0x10b   : > { %v436_v46 = vcombine.low %v384_v41, %v386_v44  ;;  %v437_v47 = vcombine.low %v425_v42, %v427_v45  ;;  %v388_v48 = vpop.f32.mrb[2].mxu0  ;;  %v429_v49 = vpop.f32.mrb[2].mxu1 }
 0x10c   : > { %v389_v50 = vpop.f32.mrb[3].mxu0  ;;  %v430_v51 = vpop.f32.mrb[3].mxu1 }
 0x10d   : > { %v444_v52 = vrot.slane %v436_v46, %v2109_v43  ;;  %v451_v53 = vrot.slane %v437_v47, %v2109_v43 }
 0x10f   : > { %v452_v55 = vcombine.low %v444_v52, %v451_v53 }
 0x111   : > { %v454_v56 = vadd.f32 %v452_v55, %v157_v54 }
 0x113   : > { %v1593_v57 = vmul.f32 -1.442695, %v454_v56  ;;  %v462_v58 = vrot.slane %v454_v56, 2  ;;  %v473_v60 = vrot.slane %v454_v56, 6  ;;  %v470_v63 = vrot.slane %v454_v56, 4 }
 0x115   : > { %1770 = vpow2.f32 %v1593_v57  ;;  %v1594_v59 = vmul.f32 -1.442695, %v462_v58  ;;  %v1595_v61 = vmul.f32 -1.442695, %v473_v60 }
 0x117   : > { %1772 = vpow2.f32 %v1594_v59 }
 0x118   : > { %1774 = vpow2.f32 %v1595_v61 }
 0x11f   : > { %v1771_v62 = vpop.eup %1770 }
 0x120   : > { %v458_v0 = vadd.f32 1.0, %v1771_v62 }
 0x121   : > { %v1773_v1 = vpop.eup %1772 }
 0x122   : > { %1776 = vrcp.f32 %v458_v0  ;;  %v467_v35 = vadd.f32 1.0, %v1773_v1  ;;  %v1775_v36 = vpop.eup %1774 }
 0x123   : > { %1778 = vtanh.f32 %v470_v63  ;;  %v478_v41 = vadd.f32 1.0, %v1775_v36  ;;  %v1596_v63 = vld [vmem:[%s1877_s18 + $0x8] sm:$0xff] }
 0x124   : > { %1780 = vrcp.f32 %v467_v35 }
 0x125   : > { %1782 = vrcp.f32 %v478_v41 }
 0x12c   : > { %v1777_v37 = vpop.eup %1776 }
 0x12d   : > { %v1779_v39 = vpop.eup %1778 }
 0x12e   : > { %v1781_v40 = vpop.eup %1780  ;;  %v482_v44 = vmul.f32 %v1779_v39, %v1777_v37 }
 0x12f   : > { %v481_v42 = vmul.f32 %v1781_v40, %v156_v38  ;;  %v1783_v46 = vpop.eup %1782 }
 0x131   : > { %v483_v45 = vadd.f32 %v482_v44, %v481_v42 }
 0x133   : > { %1784 = vtanh.f32 %v483_v45  ;;  %487 = vst [vmem:[#allocation3] sm:$0x3] %v483_v45 }
 0x13d   : > { %v1785_v47 = vpop.eup %1784 }
 0x13e   : > { %v485_v48 = vmul.f32 %v1785_v47, %v1783_v46 }
 0x140   : > { %v486_v49 = vpack.c.bf16 %v485_v48, %v485_v48  ;;  %v491_v48 = vld [vmem:[#allocation3] sm:$0x3] }
 0x142   : > { %488 = vst [vmem:[#allocation2] sm:$0x1] %v486_v49  ;;  %489 = vst [vmem:[%s1872_s15] sm:$0x1] %v486_v49 }
 0x149   : > { %v490_v50 = vld [vmem:[#allocation2] sm:$0x1] }
 0x14a   : > { %719 = vmatmul.mubr.bf16.vlgmr.msra.gmra.mrb[4].mxu0 %v490_v50  ;;  %760 = vmatmul.mubr.bf16.vlgmr.msra.gmra.mrb[4].mxu1 %v490_v50 }
 0x14b   : > { %1024 = vmatpush1.bf16.msra.mxu0 %v1895_v5  ;;  %1065 = vmatpush1.bf16.msra.mxu1 %v1900_v6 }
 0x14c   : > { %1025 = vmatprep.subr.bf16.mxu0 %v1906_v7  ;;  %1066 = vmatprep.subr.bf16.mxu1 %v1913_v8 }
 0x14d   : > { %1055 = vmatprep.mubr.bf16.mxu0 %v1844_v4  ;;  %1096 = vmatprep.mubr.bf16.mxu1 %v1844_v4 }
 0x14f   : > { %1026 = vmatpush1.bf16.msra.mxu0 %v1918_v9  ;;  %1067 = vmatpush1.bf16.msra.mxu1 %v1924_v10 }
 0x150   : > { %1027 = vmatprep.subr.bf16.mxu0 %v1930_v11  ;;  %1068 = vmatprep.subr.bf16.mxu1 %v1935_v12 }
 0x153   : > { %1028 = vmatpush1.bf16.msra.mxu0 %v1940_v13  ;;  %1069 = vmatpush1.bf16.msra.mxu1 %v1945_v14 }
 0x154   : > { %1029 = vmatprep.subr.bf16.mxu0 %v1952_v15  ;;  %1070 = vmatprep.subr.bf16.mxu1 %v1959_v16 }
 0x157   : > { %1030 = vmatpush1.bf16.msra.mxu0 %v1964_v17  ;;  %1071 = vmatpush1.bf16.msra.mxu1 %v1971_v18 }
 0x158   : > { %1031 = vmatprep.subr.bf16.mxu0 %v1976_v19  ;;  %1072 = vmatprep.subr.bf16.mxu1 %v1983_v20 }
 0x15b   : > { %1032 = vmatpush1.bf16.msra.mxu0 %v1988_v21  ;;  %1073 = vmatpush1.bf16.msra.mxu1 %v1993_v22 }
 0x15c   : > { %1033 = vmatprep.subr.bf16.mxu0 %v2000_v23  ;;  %1074 = vmatprep.subr.bf16.mxu1 %v2007_v24 }
 0x15f   : > { %1034 = vmatpush1.bf16.msra.mxu0 %v2014_v25  ;;  %1075 = vmatpush1.bf16.msra.mxu1 %v2019_v26 }
 0x160   : > { %1035 = vmatprep.subr.bf16.mxu0 %v2026_v27  ;;  %1076 = vmatprep.subr.bf16.mxu1 %v2031_v28 }
 0x163   : > { %1036 = vmatpush1.bf16.msra.mxu0 %v2038_v29  ;;  %1077 = vmatpush1.bf16.msra.mxu1 %v2043_v30 }
 0x164   : > { %1037 = vmatprep.subr.bf16.mxu0 %v2050_v31  ;;  %1078 = vmatprep.subr.bf16.mxu1 %v2055_v32 }
 0x167   : > { %1038 = vmatpush1.bf16.msra.mxu0 %v2062_v33  ;;  %1079 = vmatpush1.bf16.msra.mxu1 %v2067_v34 }
 0x168   : > { %1360 = vmatprep.subr.bf16.mxu0 %v1882_v2  ;;  %1401 = vmatprep.subr.bf16.mxu1 %v1887_v3 }
 0x21d   : > { %v720_v51 = vpop.f32.mrb[4].mxu0  ;;  %v761_v52 = vpop.f32.mrb[4].mxu1 }
 0x21e   : > { %v722_v53 = vpop.f32.mrb[5].mxu0  ;;  %v763_v54 = vpop.f32.mrb[5].mxu1 }
 0x21f   : > { %v772_v55 = vcombine.low %v720_v51, %v722_v53  ;;  %v773_v56 = vcombine.low %v761_v52, %v763_v54  ;;  %v724_v57 = vpop.f32.mrb[6].mxu0  ;;  %v765_v58 = vpop.f32.mrb[6].mxu1 }
 0x220   : > { %v725_v59 = vpop.f32.mrb[7].mxu0  ;;  %v766_v60 = vpop.f32.mrb[7].mxu1 }
 0x221   : > { %v780_v61 = vrot.slane %v772_v55, %v2109_v43  ;;  %v787_v62 = vrot.slane %v773_v56, %v2109_v43 }
 0x223   : > { %v788_v0 = vcombine.low %v780_v61, %v787_v62 }
 0x225   : > { %v790_v1 = vadd.f32 %v1596_v63, %v788_v0 }
 0x227   : > { %v1629_v2 = vmul.f32 -1.442695, %v790_v1  ;;  %v798_v35 = vrot.slane %v790_v1, 2  ;;  %v809_v36 = vrot.slane %v790_v1, 6  ;;  %v806_v39 = vrot.slane %v790_v1, 4 }
 0x229   : > { %1786 = vpow2.f32 %v1629_v2  ;;  %v1630_v3 = vmul.f32 -1.442695, %v798_v35  ;;  %v1631_v37 = vmul.f32 -1.442695, %v809_v36 }
 0x22b   : > { %1788 = vpow2.f32 %v1630_v3 }
 0x22c   : > { %1790 = vpow2.f32 %v1631_v37 }
 0x233   : > { %v1787_v38 = vpop.eup %1786 }
 0x234   : > { %v794_v40 = vadd.f32 1.0, %v1787_v38 }
 0x235   : > { %v1789_v41 = vpop.eup %1788 }
 0x236   : > { %1792 = vrcp.f32 %v794_v40  ;;  %v803_v42 = vadd.f32 1.0, %v1789_v41  ;;  %v1791_v44 = vpop.eup %1790 }
 0x237   : > { %1794 = vtanh.f32 %v806_v39  ;;  %v814_v49 = vadd.f32 1.0, %v1791_v44 }
 0x238   : > { %1796 = vrcp.f32 %v803_v42 }
 0x239   : > { %1798 = vrcp.f32 %v814_v49 }
 0x240   : > { %v1793_v45 = vpop.eup %1792 }
 0x241   : > { %v1795_v46 = vpop.eup %1794 }
 0x242   : > { %v1797_v47 = vpop.eup %1796  ;;  %v818_v51 = vmul.f32 %v1795_v46, %v1793_v45  ;;  %v1670_v46 = vld [vmem:[%s1877_s18 + $0x18] sm:$0xff] }
 0x243   : > { %v817_v50 = vmul.f32 %v1797_v47, %v491_v48  ;;  %v1799_v53 = vpop.eup %1798 }
 0x245   : > { %v819_v52 = vadd.f32 %v818_v51, %v817_v50 }
 0x247   : > { %1800 = vtanh.f32 %v819_v52  ;;  %823 = vst [vmem:[#allocation3] sm:$0x3] %v819_v52 }
 0x251   : > { %v1801_v54 = vpop.eup %1800 }
 0x252   : > { %v821_v55 = vmul.f32 %v1801_v54, %v1799_v53 }
 0x254   : > { %v822_v56 = vpack.c.bf16 %v821_v55, %v821_v55 }
 0x256   : > { %1632 = vst [vmem:[%s1872_s15 + $0x1] sm:$0x1] %v822_v56  ;;  %824 = vst [vmem:[#allocation2] sm:$0x1] %v822_v56 }
 0x25d   : > { %v827_v57 = vld [vmem:[#allocation2] sm:$0x1] }
 0x25e   : > { %1056 = vmatmul.mubr.bf16.vlgmr.msra.gmra.mrb[8].mxu0 %v827_v57  ;;  %1097 = vmatmul.mubr.bf16.vlgmr.msra.gmra.mrb[8].mxu1 %v827_v57 }
 0x25f   : > { %1361 = vmatpush1.bf16.msra.mxu0 %v1895_v5  ;;  %1402 = vmatpush1.bf16.msra.mxu1 %v1900_v6 }
 0x260   : > { %1362 = vmatprep.subr.bf16.mxu0 %v1906_v7  ;;  %1403 = vmatprep.subr.bf16.mxu1 %v1913_v8 }
 0x261   : > { %1392 = vmatprep.mubr.bf16.mxu0 %v1844_v4  ;;  %1433 = vmatprep.mubr.bf16.mxu1 %v1844_v4 }
 0x263   : > { %1363 = vmatpush1.bf16.msra.mxu0 %v1918_v9  ;;  %1404 = vmatpush1.bf16.msra.mxu1 %v1924_v10 }
 0x264   : > { %1364 = vmatprep.subr.bf16.mxu0 %v1930_v11  ;;  %1405 = vmatprep.subr.bf16.mxu1 %v1935_v12 }
 0x267   : > { %1365 = vmatpush1.bf16.msra.mxu0 %v1940_v13  ;;  %1406 = vmatpush1.bf16.msra.mxu1 %v1945_v14 }
 0x268   : > { %1366 = vmatprep.subr.bf16.mxu0 %v1952_v15  ;;  %1407 = vmatprep.subr.bf16.mxu1 %v1959_v16  ;;  %v1633_v16 = vld [vmem:[%s1877_s18 + $0x10] sm:$0xff] }
 0x26b   : > { %1367 = vmatpush1.bf16.msra.mxu0 %v1964_v17  ;;  %1408 = vmatpush1.bf16.msra.mxu1 %v1971_v18 }
 0x26c   : > { %1368 = vmatprep.subr.bf16.mxu0 %v1976_v19  ;;  %1409 = vmatprep.subr.bf16.mxu1 %v1983_v20 }
 0x26f   : > { %1369 = vmatpush1.bf16.msra.mxu0 %v1988_v21  ;;  %1410 = vmatpush1.bf16.msra.mxu1 %v1993_v22 }
 0x270   : > { %1370 = vmatprep.subr.bf16.mxu0 %v2000_v23  ;;  %1411 = vmatprep.subr.bf16.mxu1 %v2007_v24 }
 0x273   : > { %1371 = vmatpush1.bf16.msra.mxu0 %v2014_v25  ;;  %1412 = vmatpush1.bf16.msra.mxu1 %v2019_v26 }
 0x274   : > { %1372 = vmatprep.subr.bf16.mxu0 %v2026_v27  ;;  %1413 = vmatprep.subr.bf16.mxu1 %v2031_v28 }
 0x277   : > { %1373 = vmatpush1.bf16.msra.mxu0 %v2038_v29  ;;  %1414 = vmatpush1.bf16.msra.mxu1 %v2043_v30 }
 0x278   : > { %1374 = vmatprep.subr.bf16.mxu0 %v2050_v31  ;;  %1415 = vmatprep.subr.bf16.mxu1 %v2055_v32 }
 0x27b   : > { %1375 = vmatpush1.bf16.msra.mxu0 %v2062_v33  ;;  %1416 = vmatpush1.bf16.msra.mxu1 %v2067_v34  ;;  %v828_v33 = vld [vmem:[#allocation3] sm:$0x3] }
 0x331   : > { %v1057_v4 = vpop.f32.mrb[8].mxu0  ;;  %v1098_v5 = vpop.f32.mrb[8].mxu1 }
 0x332   : > { %v1059_v6 = vpop.f32.mrb[9].mxu0  ;;  %v1100_v7 = vpop.f32.mrb[9].mxu1 }
 0x333   : > { %v1109_v8 = vcombine.low %v1057_v4, %v1059_v6  ;;  %v1110_v9 = vcombine.low %v1098_v5, %v1100_v7  ;;  %v1061_v10 = vpop.f32.mrb[10].mxu0  ;;  %v1102_v11 = vpop.f32.mrb[10].mxu1 }
 0x334   : > { %v1062_v12 = vpop.f32.mrb[11].mxu0  ;;  %v1103_v13 = vpop.f32.mrb[11].mxu1 }
 0x335   : > { %v1117_v14 = vrot.slane %v1109_v8, %v2109_v43  ;;  %v1124_v15 = vrot.slane %v1110_v9, %v2109_v43 }
 0x337   : > { %v1125_v17 = vcombine.low %v1117_v14, %v1124_v15 }
 0x339   : > { %v1127_v18 = vadd.f32 %v1633_v16, %v1125_v17 }
 0x33b   : > { %v1666_v19 = vmul.f32 -1.442695, %v1127_v18  ;;  %v1135_v20 = vrot.slane %v1127_v18, 2  ;;  %v1146_v22 = vrot.slane %v1127_v18, 6  ;;  %v1143_v25 = vrot.slane %v1127_v18, 4 }
 0x33d   : > { %1802 = vpow2.f32 %v1666_v19  ;;  %v1667_v21 = vmul.f32 -1.442695, %v1135_v20  ;;  %v1668_v23 = vmul.f32 -1.442695, %v1146_v22 }
 0x33f   : > { %1804 = vpow2.f32 %v1667_v21 }
 0x340   : > { %1806 = vpow2.f32 %v1668_v23 }
 0x347   : > { %v1803_v24 = vpop.eup %1802 }
 0x348   : > { %v1131_v26 = vadd.f32 1.0, %v1803_v24 }
 0x349   : > { %v1805_v27 = vpop.eup %1804 }
 0x34a   : > { %1808 = vrcp.f32 %v1131_v26  ;;  %v1140_v28 = vadd.f32 1.0, %v1805_v27  ;;  %v1807_v29 = vpop.eup %1806 }
 0x34b   : > { %1810 = vtanh.f32 %v1143_v25  ;;  %v1151_v34 = vadd.f32 1.0, %v1807_v29 }
 0x34c   : > { %1812 = vrcp.f32 %v1140_v28 }
 0x34d   : > { %1814 = vrcp.f32 %v1151_v34 }
 0x354   : > { %v1809_v30 = vpop.eup %1808 }
 0x355   : > { %v1811_v31 = vpop.eup %1810 }
 0x356   : > { %v1813_v32 = vpop.eup %1812  ;;  %v1155_v59 = vmul.f32 %v1811_v31, %v1809_v30 }
 0x357   : > { %v1154_v58 = vmul.f32 %v1813_v32, %v828_v33  ;;  %v1815_v61 = vpop.eup %1814 }
 0x359   : > { %v1156_v60 = vadd.f32 %v1155_v59, %v1154_v58 }
 0x35b   : > { %1816 = vtanh.f32 %v1156_v60  ;;  %1160 = vst [vmem:[#allocation3] sm:$0x3] %v1156_v60 }
 0x362   : > { %v1165_v8 = vld [vmem:[#allocation3] sm:$0x3] }
 0x365   : > { %v1817_v62 = vpop.eup %1816 }
 0x366   : > { %v1158_v63 = vmul.f32 %v1817_v62, %v1815_v61 }
 0x368   : > { %v1159_v0 = vpack.c.bf16 %v1158_v63, %v1158_v63 }
 0x36a   : > { %1669 = vst [vmem:[%s1872_s15 + $0x2] sm:$0x1] %v1159_v0  ;;  %1161 = vst [vmem:[#allocation2] sm:$0x1] %v1159_v0 }
 0x371   : > { %v1164_v1 = vld [vmem:[#allocation2] sm:$0x1] }
 0x372   : > { %1393 = vmatmul.mubr.bf16.vlgmr.msra.gmra.mrb[12].mxu0 %v1164_v1  ;;  %1434 = vmatmul.mubr.bf16.vlgmr.msra.gmra.mrb[12].mxu1 %v1164_v1 }
 0x445   : > { %v1394_v2 = vpop.f32.mrb[12].mxu0  ;;  %v1435_v35 = vpop.f32.mrb[12].mxu1 }
 0x446   : > { %v1396_v3 = vpop.f32.mrb[13].mxu0  ;;  %v1437_v36 = vpop.f32.mrb[13].mxu1 }
 0x447   : > { %v1446_v37 = vcombine.low %v1394_v2, %v1396_v3  ;;  %v1447_v38 = vcombine.low %v1435_v35, %v1437_v36  ;;  %v1398_v39 = vpop.f32.mrb[14].mxu0  ;;  %v1439_v40 = vpop.f32.mrb[14].mxu1 }
 0x448   : > { %v1399_v41 = vpop.f32.mrb[15].mxu0  ;;  %v1440_v42 = vpop.f32.mrb[15].mxu1 }
 0x449   : > { %v1454_v44 = vrot.slane %v1446_v37, %v2109_v43  ;;  %v1461_v45 = vrot.slane %v1447_v38, %v2109_v43 }
 0x44b   : > { %v1462_v47 = vcombine.low %v1454_v44, %v1461_v45 }
 0x44d   : > { %v1464_v48 = vadd.f32 %v1670_v46, %v1462_v47 }
 0x44f   : > { %v1703_v49 = vmul.f32 -1.442695, %v1464_v48  ;;  %v1472_v50 = vrot.slane %v1464_v48, 2  ;;  %v1483_v52 = vrot.slane %v1464_v48, 6  ;;  %v1480_v55 = vrot.slane %v1464_v48, 4 }
 0x451   : > { %1818 = vpow2.f32 %v1703_v49  ;;  %v1704_v51 = vmul.f32 -1.442695, %v1472_v50  ;;  %v1705_v53 = vmul.f32 -1.442695, %v1483_v52 }
 0x453   : > { %1820 = vpow2.f32 %v1704_v51 }
 0x454   : > { %1822 = vpow2.f32 %v1705_v53 }
 0x45b   : > { %v1819_v54 = vpop.eup %1818 }
 0x45c   : > { %v1468_v56 = vadd.f32 1.0, %v1819_v54 }
 0x45d   : > { %v1821_v57 = vpop.eup %1820 }
 0x45e   : > { %1824 = vrcp.f32 %v1468_v56  ;;  %v1477_v4 = vadd.f32 1.0, %v1821_v57  ;;  %v1823_v43 = vpop.eup %1822 }
 0x45f   : > { %1826 = vtanh.f32 %v1480_v55  ;;  %v1488_v9 = vadd.f32 1.0, %v1823_v43 }
 0x460   : > { %1828 = vrcp.f32 %v1477_v4 }
 0x461   : > { %1830 = vrcp.f32 %v1488_v9 }
 0x468   : > { %v1825_v5 = vpop.eup %1824 }
 0x469   : > { %v1827_v6 = vpop.eup %1826 }
 0x46a   : > { %v1829_v7 = vpop.eup %1828  ;;  %v1492_v11 = vmul.f32 %v1827_v6, %v1825_v5 }
 0x46b   : > { %v1491_v10 = vmul.f32 %v1829_v7, %v1165_v8  ;;  %v1831_v13 = vpop.eup %1830 }
 0x46d   : > { %v1493_v12 = vadd.f32 %v1492_v11, %v1491_v10 }
 0x46f   : > { %1832 = vtanh.f32 %v1493_v12  ;;  %1497 = vst [vmem:[#allocation3] sm:$0x3] %v1493_v12 }
 0x479   : > { %v1833_v14 = vpop.eup %1832 }
 0x47a   : > { %v1495_v15 = vmul.f32 %v1833_v14, %v1831_v13 }
 0x47c   : > { %v1496_v16 = vpack.c.bf16 %v1495_v15, %v1495_v15 }
 0x47e   : > { %1498 = vst [vmem:[#allocation2] sm:$0x1] %v1496_v16  ;;  %1706 = vst [vmem:[%s1872_s15 + $0x3] sm:$0x1] %v1496_v16 }
 0x47f PF: > { %s12_s9 = sadd.s32 1, %s1840_s9  }
 0x480   : > { %p9_p5 = scmp.ge.s32.totalorder %s12_s9, 5  }
 0x482   :  { %11 = sbr.rel (!%p9_p5) target bundleno = 1 (0x1), region = 68 }

</bundles_post_ra>
